<compile_context>
chip_gen: v5e
topology: v5e:2x2
jax: 0.10.0
libtpu: 0.0.40
codegen_flags: <defaults>
</compile_context>

<pallas_src>
import functools

import jax
import jax.numpy as jnp
from jax import lax
from jax.experimental import pallas as pl
from jax.experimental.pallas import tpu as pltpu


# ------------------------ hardware-aware sizing helpers ------------------------
def _vmem_budgets():
    """(pipeline_budget_bytes, scoped_vmem_limit_bytes) for this generation."""
    cap = 64 * 1024 * 1024  # conservative default (v7x per-TC VMEM)
    try:
        cap = int(pltpu.get_tpu_info().vmem_capacity_bytes)
    except Exception:
        pass
    # Leave headroom for Mosaic internal scratch, accumulators, output slabs:
    #   64 MiB parts (v7x)      -> ~44 MiB scoped / ~22 MiB of pipelined blocks
    #   128 MiB parts (v5e/v6e) -> ~96 MiB scoped / ~48 MiB of pipelined blocks
    limit = max(32 * 1024 * 1024, min(cap - 20 * 1024 * 1024, 96 * 1024 * 1024))
    return limit // 2, limit


def _num_tensorcores():
    """Best-effort TensorCores-per-device count (1 on v5e/v6e, 2 on v7x)."""
    try:
        info = pltpu.get_tpu_info()
        for attr in ("num_cores", "core_count", "num_tensorcores",
                     "tensorcore_count", "cores_per_chip"):
            v = getattr(info, attr, None)
            if isinstance(v, int) and v >= 1:
                return max(1, min(v, 2))
    except Exception:
        pass
    v = getattr(jax.devices()[0], "num_cores", None)
    if isinstance(v, int) and v >= 1:
        return max(1, min(v, 2))
    return 1


def _choose_tile_b(batch, n, itemsize, bytes_per_row, budget_bytes):
    """Largest batch-tile whose pipelined working set stays under the budget."""
    rows = budget_bytes // max(1, bytes_per_row)
    if rows >= batch:
        return batch  # single block covering the whole batch (full-dim exemption)
    sub = 8 * max(1, 4 // itemsize)   # sublane-aligned: 8 f32 / 16 bf16 / 32 int8
    rows = max(sub, (rows // sub) * sub)
    return min(rows, batch)


def _lane_dense_shape(b, n):
    """If N isn't lane-dense, find an equivalent (rows, L) view, L % 128 == 0."""
    if n % 128 == 0:
        return None
    total = b * n
    for lanes in (2048, 1024, 512, 256, 128):
        if total % lanes == 0:
            return (total // lanes, lanes)
    return None


# ----------------------------- reduction='mean' ------------------------------
def _mse_mean_kernel(x_ref, t_ref, out_ref, acc_pos, acc_neg, *,
                     tile_b, steps_per_core, batch, need_mask, slab):
    c = pl.program_id(0)
    k = pl.program_id(1)

    @pl.when(k == 0)
    def _():
        acc_pos[...] = jnp.zeros_like(acc_pos)
        acc_neg[...] = jnp.zeros_like(acc_neg)

    def accumulate(mask_tail):
        x = x_ref[...].astype(jnp.float32)
        t = t_ref[...].astype(jnp.float32)
        diff = x - t
        pos_c = t == 1.0
        neg_c = t == 0.0
        if mask_tail:
            # Logical (unclamped) row index; rows past the real batch contribute 0.
            row0 = (c * steps_per_core + k) * tile_b
            valid = row0 + lax.broadcasted_iota(jnp.int32, x.shape, 0) < batch
            pos_c = jnp.logical_and(pos_c, valid)
            neg_c = jnp.logical_and(neg_c, valid)
        pos = jnp.where(pos_c, diff * diff, 0.0)
        neg = jnp.where(neg_c, x * x, 0.0)
        if slab:
            # tile_b % 8 == 0: fold the tile into the (8, N) accumulator with
            # pure VPU adds (no per-step cross-sublane XLU reduce).
            n = x.shape[1]
            acc_pos[...] += jnp.sum(pos.reshape(tile_b // 8, 8, n), axis=0)
            acc_neg[...] += jnp.sum(neg.reshape(tile_b // 8, 8, n), axis=0)
        else:
            acc_pos[0:1, :] = acc_pos[0:1, :] + jnp.sum(pos, axis=0, keepdims=True)
            acc_neg[0:1, :] = acc_neg[0:1, :] + jnp.sum(neg, axis=0, keepdims=True)

    if need_mask:
        # Only the tail / padded steps pay for the row mask.
        is_tail = (c * steps_per_core + k) * tile_b + tile_b > batch

        @pl.when(is_tail)
        def _():
            accumulate(True)

        @pl.when(jnp.logical_not(is_tail))
        def _():
            accumulate(False)
    else:
        accumulate(False)

    @pl.when(k == pl.num_programs(1) - 1)
    def _():
        # Single cross-sublane/lane reduce at the very end; lane-dense store.
        pos_total = jnp.sum(acc_pos[...])
        neg_total = jnp.sum(acc_neg[...])
        lane = lax.broadcasted_iota(jnp.int32, out_ref.shape, 2)
        out_ref[...] = jnp.where(lane == 0, pos_total,
                                 jnp.where(lane == 1, neg_total, 0.0))


def _mse_mean(inputs, targets, *, tile_b=None):
    orig_b = inputs.shape[0]
    # mean_b(sum_n(.)) == total_sum / B, so a lane-dense reshape is legal here.
    flat = _lane_dense_shape(*inputs.shape)
    if flat is not None:
        inputs = inputs.reshape(flat)
        targets = targets.reshape(flat)

    B, N = inputs.shape
    itemsize = inputs.dtype.itemsize
    budget, vmem_limit = _vmem_budgets()
    # Per-row working set: 2 double-buffered input blocks + ~3 f32 intermediates
    # (covers the f32 upcast of narrow dtypes); accumulators taken off the top.
    acc_bytes = 2 * 8 * N * 4
    row_bytes = 2 * 2 * N * itemsize + 3 * N * 4
    if tile_b is None:
        tile_b = _choose_tile_b(B, N, itemsize, row_bytes,
                                max(row_bytes, budget - acc_bytes))
    tile_b = max(1, min(tile_b, B))

    n_blocks = pl.cdiv(B, tile_b)
    n_cores = _num_tensorcores()
    n_split = n_cores if (n_cores > 1 and n_blocks >= n_cores) else 1
    steps_per_core = pl.cdiv(n_blocks, n_split)
    need_mask = (n_split * steps_per_core * tile_b) != B
    slab = (tile_b % 8 == 0)

    def in_map(c, k):
        # Clamp so padded grid steps never DMA out of bounds; their rows are
        # masked out inside the kernel via the logical row index.
        return (jnp.minimum(c * steps_per_core + k, n_blocks - 1), 0)

    kernel = functools.partial(
        _mse_mean_kernel, tile_b=tile_b, steps_per_core=steps_per_core,
        batch=B, need_mask=need_mask, slab=slab)

    def run(leading_sem):
        return pl.pallas_call(
            kernel,
            out_shape=jax.ShapeDtypeStruct((n_split, 8, 128), jnp.float32),
            grid_spec=pltpu.PrefetchScalarGridSpec(
                num_scalar_prefetch=0,
                grid=(n_split, steps_per_core),
                in_specs=[
                    pl.BlockSpec((tile_b, N), in_map),
                    pl.BlockSpec((tile_b, N), in_map),
                ],
                out_specs=pl.BlockSpec((1, 8, 128), lambda c, k: (c, 0, 0)),
                scratch_shapes=[
                    pltpu.VMEM((8, N), jnp.float32),
                    pltpu.VMEM((8, N), jnp.float32),
                ],
            ),
            compiler_params=pltpu.CompilerParams(
                dimension_semantics=(leading_sem, "arbitrary"),
                vmem_limit_bytes=vmem_limit,
            ),
            cost_estimate=pl.CostEstimate(
                flops=6 * B * N,
                transcendentals=0,
                bytes_accessed=2 * B * N * itemsize + n_split * 8 * 128 * 4),
        )(inputs, targets)

    if n_split > 1:
        # Real cross-TensorCore sharding of the batch reduction (v7x).
        try:
            out = run(getattr(pltpu, "CORE_PARALLEL", "parallel"))
        except Exception:
            out = run("parallel")
    else:
        out = run("arbitrary")

    inv_b = jnp.float32(1.0) / jnp.float32(orig_b)
    pos = jnp.sum(out[:, 0, 0]) * inv_b
    neg = jnp.sum(out[:, 0, 1]) * inv_b
    return pos, neg


# ----------------------------- reduction='none' ------------------------------
def _mse_none_kernel(x_ref, t_ref, pos_ref, neg_ref):
    x = x_ref[...].astype(jnp.float32)
    t = t_ref[...].astype(jnp.float32)
    diff = x - t
    pos_ref[...] = jnp.where(t == 1.0, diff * diff, 0.0).astype(pos_ref.dtype)
    neg_ref[...] = jnp.where(t == 0.0, x * x, 0.0).astype(neg_ref.dtype)


def _mse_none(inputs, targets, *, tile_b=None):
    orig_shape = inputs.shape
    # Lane-dense view when N % 128 != 0 (purely elementwise, always legal);
    # keeps output stores unmasked / full-lane.
    flat = _lane_dense_shape(*orig_shape)
    if flat is not None:
        inputs = inputs.reshape(flat)
        targets = targets.reshape(flat)

    B, N = inputs.shape
    out_dtype = inputs.dtype
    itemsize = inputs.dtype.itemsize
    budget, vmem_limit = _vmem_budgets()
    # 2 inputs + 2 outputs, all double-buffered, plus ~3 f32 intermediates.
    row_bytes = 2 * 4 * N * itemsize + 3 * N * 4
    if tile_b is None:
        tile_b = _choose_tile_b(B, N, itemsize, row_bytes, max(row_bytes, budget))
    tile_b = max(1, min(tile_b, B))
    grid = (pl.cdiv(B, tile_b),)

    pos, neg = pl.pallas_call(
        _mse_none_kernel,
        out_shape=(
            jax.ShapeDtypeStruct((B, N), out_dtype),
            jax.ShapeDtypeStruct((B, N), out_dtype),
        ),
        grid_spec=pltpu.PrefetchScalarGridSpec(
            num_scalar_prefetch=0,
            grid=grid,
            in_specs=[
                pl.BlockSpec((tile_b, N), lambda i: (i, 0)),
                pl.BlockSpec((tile_b, N), lambda i: (i, 0)),
            ],
            out_specs=[
                pl.BlockSpec((tile_b, N), lambda i: (i, 0)),
                pl.BlockSpec((tile_b, N), lambda i: (i, 0)),
            ],
        ),
        compiler_params=pltpu.CompilerParams(
            dimension_semantics=("parallel",),
            vmem_limit_bytes=vmem_limit,
        ),
        cost_estimate=pl.CostEstimate(
            flops=6 * B * N,
            transcendentals=0,
            bytes_accessed=2 * B * N * itemsize + 2 * B * N * out_dtype.itemsize),
    )(inputs, targets)

    if flat is not None:
        pos = pos.reshape(orig_shape)
        neg = neg.reshape(orig_shape)
    return pos, neg


# ------------------------------ module wrapper --------------------------------
class MSELoss:
    """Pallas-TPU equivalent of the PyTorch MSELoss module."""

    def __init__(self, reduction="mean"):
        self.reduction = reduction

    def __call__(self, inputs, targets, *, tile_b=None):
        if self.reduction == "mean":
            return _mse_mean(inputs, targets, tile_b=tile_b)
        return _mse_none(inputs, targets, tile_b=tile_b)


# ---------------------------------- demo --------------------------------------
if __name__ == "__main__":
    key = jax.random.PRNGKey(0)
    k_x, k_t, k_x2, k_t2 = jax.random.split(key, 4)

    def ref_losses(x, t):
        pos_id = (t == 1.0).astype(jnp.float32)
        neg_id = (t == 0.0).astype(jnp.float32)
        pos_e = pos_id * (x - t) ** 2
        neg_e = neg_id * x ** 2
        return (jnp.mean(jnp.sum(pos_e, axis=1)),
                jnp.mean(jnp.sum(neg_e, axis=1)),
                pos_e, neg_e)

    # Case 1: [batch, num_anchors] = [16, 256]; auto tiling -> one big block.
    B, N = 16, 256
    inputs = jax.random.uniform(k_x, (B, N), dtype=jnp.float32)
    targets = jax.random.randint(k_t, (B, N), minval=-1, maxval=2).astype(jnp.float32)

    pos_loss, neg_loss = MSELoss(reduction="mean")(inputs, targets)
    jax.block_until_ready((pos_loss, neg_loss))
    rp, rn, rpe, rne = ref_losses(inputs, targets)
    assert jnp.allclose(pos_loss, rp, rtol=1e-5, atol=1e-5)
    assert jnp.allclose(neg_loss, rn, rtol=1e-5, atol=1e-5)

    pos_e, neg_e = MSELoss(reduction="none")(inputs, targets)
    jax.block_until_ready((pos_e, neg_e))
    assert pos_e.dtype == inputs.dtype and neg_e.dtype == inputs.dtype
    assert jnp.allclose(pos_e, rpe, atol=1e-6)
    assert jnp.allclose(neg_e, rne, atol=1e-6)

    # Case 2: batch not divisible by 8 / by the tile; exercises (a) the single
    # full-batch block with the non-slab accumulator and (b) a forced small
    # tile with multi-block pipelining + pl.when-gated tail-row masking.
    B2, N2 = 20, 256
    x2 = jax.random.uniform(k_x2, (B2, N2), dtype=jnp.float32)
    t2 = jax.random.randint(k_t2, (B2, N2), minval=-1, maxval=2).astype(jnp.float32)
    rp2, rn2, rpe2, rne2 = ref_losses(x2, t2)

    p2a, n2a = MSELoss(reduction="mean")(x2, t2)            # auto tile
    p2b, n2b = MSELoss(reduction="mean")(x2, t2, tile_b=8)  # multi-block + mask
    jax.block_until_ready((p2a, n2a, p2b, n2b))
    assert jnp.allclose(p2a, rp2, rtol=1e-5, atol=1e-5)
    assert jnp.allclose(n2a, rn2, rtol=1e-5, atol=1e-5)
    assert jnp.allclose(p2b, rp2, rtol=1e-5, atol=1e-5)
    assert jnp.allclose(n2b, rn2, rtol=1e-5, atol=1e-5)

    pe2, ne2 = MSELoss(reduction="none")(x2, t2, tile_b=8)
    jax.block_until_ready((pe2, ne2))
    assert jnp.allclose(pe2, rpe2, atol=1e-6)
    assert jnp.allclose(ne2, rne2, atol=1e-6)

    print("KERNEL_OK")
</pallas_src>

<mosaic_0001>
module attributes {stable_mosaic.version = 11 : i64} {
  func.func @_mse_mean_kernel(%arg0: i32, %arg1: i32, %arg2: memref<16x256xf32, #tpu.memory_space<vmem>>, %arg3: memref<16x256xf32, #tpu.memory_space<vmem>>, %arg4: memref<1x8x128xf32, #tpu.memory_space<vmem>>, %arg5: memref<8x256xf32, #tpu.memory_space<vmem>>, %arg6: memref<8x256xf32, #tpu.memory_space<vmem>>) attributes {dimension_semantics = [#tpu.dimension_semantics<arbitrary>, #tpu.dimension_semantics<arbitrary>], iteration_bounds = array<i64: 1, 1>, scalar_prefetch = 0 : i64, scratch_operands = 2 : i64, tpu.core_type = #tpu.core_type<tc>, window_params = [{transform_indices = @transform_0, window_bounds = array<i64: 16, 256>}, {transform_indices = @transform_1, window_bounds = array<i64: 16, 256>}, {transform_indices = @transform_2, window_bounds = array<i64: 1, 8, 128>}]} {
    %c0_i32 = arith.constant 0 : i32
    %0 = arith.cmpi eq, %arg1, %c0_i32 : i32
    %1 = arith.extui %0 : i1 to i32
    %c0_i32_0 = arith.constant 0 : i32
    %2 = arith.cmpi ne, %1, %c0_i32_0 : i32
    scf.if %2 {
      %cst_19 = arith.constant 0.000000e+00 : f32
      %29 = vector.broadcast %cst_19 : f32 to vector<8x256xf32>
      %c0_20 = arith.constant 0 : index
      %c0_21 = arith.constant 0 : index
      %30 = vector.load %arg5[%c0_20, %c0_21] : memref<8x256xf32, #tpu.memory_space<vmem>>, vector<8x256xf32>
      tpu.vector_store %arg5[%c0_20, %c0_21], %29 {strides = array<i32>} : memref<8x256xf32, #tpu.memory_space<vmem>>, vector<8x256xf32>,
      %cst_22 = arith.constant 0.000000e+00 : f32
      %31 = vector.broadcast %cst_22 : f32 to vector<8x256xf32>
      %c0_23 = arith.constant 0 : index
      %c0_24 = arith.constant 0 : index
      %32 = vector.load %arg6[%c0_23, %c0_24] : memref<8x256xf32, #tpu.memory_space<vmem>>, vector<8x256xf32>
      tpu.vector_store %arg6[%c0_23, %c0_24], %31 {strides = array<i32>} : memref<8x256xf32, #tpu.memory_space<vmem>>, vector<8x256xf32>,
    } else {
    }
    %c0 = arith.constant 0 : index
    %c0_1 = arith.constant 0 : index
    %3 = vector.load %arg2[%c0, %c0_1] : memref<16x256xf32, #tpu.memory_space<vmem>>, vector<16x256xf32>
    %c0_2 = arith.constant 0 : index
    %c0_3 = arith.constant 0 : index
    %4 = vector.load %arg3[%c0_2, %c0_3] : memref<16x256xf32, #tpu.memory_space<vmem>>, vector<16x256xf32>
    %5 = arith.subf %3, %4 : vector<16x256xf32>
    %cst = arith.constant 1.000000e+00 : f32
    %6 = vector.broadcast %cst : f32 to vector<16x256xf32>
    %7 = arith.cmpf oeq, %4, %6 : vector<16x256xf32>
    %cst_4 = arith.constant 0.000000e+00 : f32
    %8 = vector.broadcast %cst_4 : f32 to vector<16x256xf32>
    %9 = arith.cmpf oeq, %4, %8 : vector<16x256xf32>
    %10 = arith.mulf %5, %5 : vector<16x256xf32>
    %cst_5 = arith.constant 0.000000e+00 : f32
    %11 = vector.broadcast %cst_5 : f32 to vector<16x256xf32>
    %12 = arith.select %7, %10, %11 : vector<16x256xi1>, vector<16x256xf32>
    %13 = arith.mulf %3, %3 : vector<16x256xf32>
    %cst_6 = arith.constant 0.000000e+00 : f32
    %14 = vector.broadcast %cst_6 : f32 to vector<16x256xf32>
    %15 = arith.select %9, %13, %14 : vector<16x256xi1>, vector<16x256xf32>
    %c0_7 = arith.constant 0 : index
    %c0_8 = arith.constant 0 : index
    %16 = vector.load %arg5[%c0_7, %c0_8] : memref<8x256xf32, #tpu.memory_space<vmem>>, vector<8x256xf32>
    %17 = vector.shape_cast %12 : vector<16x256xf32> to vector<2x8x256xf32>
    %cst_9 = arith.constant dense<0.000000e+00> : vector<8x256xf32>
    %18 = vector.multi_reduction <add>, %17, %cst_9 [0] : vector<2x8x256xf32> to vector<8x256xf32>
    %19 = arith.addf %16, %18 : vector<8x256xf32>
    %c0_10 = arith.constant 0 : index
    %c0_11 = arith.constant 0 : index
    %20 = vector.load %arg5[%c0_10, %c0_11] : memref<8x256xf32, #tpu.memory_space<vmem>>, vector<8x256xf32>
    tpu.vector_store %arg5[%c0_10, %c0_11], %19 {strides = array<i32>} : memref<8x256xf32, #tpu.memory_space<vmem>>, vector<8x256xf32>,
    %c0_12 = arith.constant 0 : index
    %c0_13 = arith.constant 0 : index
    %21 = vector.load %arg6[%c0_12, %c0_13] : memref<8x256xf32, #tpu.memory_space<vmem>>, vector<8x256xf32>
    %22 = vector.shape_cast %15 : vector<16x256xf32> to vector<2x8x256xf32>
    %cst_14 = arith.constant dense<0.000000e+00> : vector<8x256xf32>
    %23 = vector.multi_reduction <add>, %22, %cst_14 [0] : vector<2x8x256xf32> to vector<8x256xf32>
    %24 = arith.addf %21, %23 : vector<8x256xf32>
    %c0_15 = arith.constant 0 : index
    %c0_16 = arith.constant 0 : index
    %25 = vector.load %arg6[%c0_15, %c0_16] : memref<8x256xf32, #tpu.memory_space<vmem>>, vector<8x256xf32>
    tpu.vector_store %arg6[%c0_15, %c0_16], %24 {strides = array<i32>} : memref<8x256xf32, #tpu.memory_space<vmem>>, vector<8x256xf32>,
    %c0_i32_17 = arith.constant 0 : i32
    %26 = arith.cmpi eq, %arg1, %c0_i32_17 : i32
    %27 = arith.extui %26 : i1 to i32
    %c0_i32_18 = arith.constant 0 : i32
    %28 = arith.cmpi ne, %27, %c0_i32_18 : i32
    scf.if %28 {
      %c0_19 = arith.constant 0 : index
      %c0_20 = arith.constant 0 : index
      %29 = vector.load %arg5[%c0_19, %c0_20] : memref<8x256xf32, #tpu.memory_space<vmem>>, vector<8x256xf32>
      %30 = vector.shape_cast %29 : vector<8x256xf32> to vector<1x8x256xf32>
      %cst_21 = arith.constant dense<0.000000e+00> : vector<1xf32>
      %31 = vector.multi_reduction <add>, %30, %cst_21 [1, 2] : vector<1x8x256xf32> to vector<1xf32>
      %32 = vector.shape_cast %31 : vector<1xf32> to vector<1x1x1xf32>
      %33 = vector.extract %32[0, 0, 0] : f32 from vector<1x1x1xf32>
      %c0_22 = arith.constant 0 : index
      %c0_23 = arith.constant 0 : index
      %34 = vector.load %arg6[%c0_22, %c0_23] : memref<8x256xf32, #tpu.memory_space<vmem>>, vector<8x256xf32>
      %35 = vector.shape_cast %34 : vector<8x256xf32> to vector<1x8x256xf32>
      %cst_24 = arith.constant dense<0.000000e+00> : vector<1xf32>
      %36 = vector.multi_reduction <add>, %35, %cst_24 [1, 2] : vector<1x8x256xf32> to vector<1xf32>
      %37 = vector.shape_cast %36 : vector<1xf32> to vector<1x1x1xf32>
      %38 = vector.extract %37[0, 0, 0] : f32 from vector<1x1x1xf32>
      %39 = tpu.iota {dimensions = array<i32: 2>} : vector<1x8x128xi32>
      %c0_i32_25 = arith.constant 0 : i32
      %40 = vector.broadcast %c0_i32_25 : i32 to vector<1x8x128xi32>
      %41 = arith.cmpi eq, %39, %40 : vector<1x8x128xi32>
      %c1_i32 = arith.constant 1 : i32
      %42 = vector.broadcast %c1_i32 : i32 to vector<1x8x128xi32>
      %43 = arith.cmpi eq, %39, %42 : vector<1x8x128xi32>
      %cst_26 = arith.constant 0.000000e+00 : f32
      %44 = vector.broadcast %38 : f32 to vector<1x8x128xf32>
      %45 = vector.broadcast %cst_26 : f32 to vector<1x8x128xf32>
      %46 = arith.select %43, %44, %45 : vector<1x8x128xi1>, vector<1x8x128xf32>
      %47 = vector.broadcast %33 : f32 to vector<1x8x128xf32>
      %48 = arith.select %41, %47, %46 : vector<1x8x128xi1>, vector<1x8x128xf32>
      %c0_27 = arith.constant 0 : index
      %c0_28 = arith.constant 0 : index
      %c0_29 = arith.constant 0 : index
      %49 = vector.load %arg4[%c0_27, %c0_28, %c0_29] : memref<1x8x128xf32, #tpu.memory_space<vmem>>, vector<1x8x128xf32>
      tpu.vector_store %arg4[%c0_27, %c0_28, %c0_29], %48 {strides = array<i32>} : memref<1x8x128xf32, #tpu.memory_space<vmem>>, vector<1x8x128xf32>,
    } else {
    }
    return
  }
  func.func @transform_0(%arg0: i32, %arg1: i32) -> (i32, i32) {
    %c1_i32 = arith.constant 1 : i32
    %0 = arith.muli %arg0, %c1_i32 : i32
    %1 = arith.addi %0, %arg1 : i32
    %c0_i32 = arith.constant 0 : i32
    %2 = arith.minsi %1, %c0_i32 : i32
    %c0_i32_0 = arith.constant 0 : i32
    %c0_i32_1 = arith.constant 0 : i32
    return %2, %c0_i32_0 : i32, i32
  }
  func.func @transform_1(%arg0: i32, %arg1: i32) -> (i32, i32) {
    %c1_i32 = arith.constant 1 : i32
    %0 = arith.muli %arg0, %c1_i32 : i32
    %1 = arith.addi %0, %arg1 : i32
    %c0_i32 = arith.constant 0 : i32
    %2 = arith.minsi %1, %c0_i32 : i32
    %c0_i32_0 = arith.constant 0 : i32
    %c0_i32_1 = arith.constant 0 : i32
    return %2, %c0_i32_0 : i32, i32
  }
  func.func @transform_2(%arg0: i32, %arg1: i32) -> (i32, i32, i32) {
    %c0_i32 = arith.constant 0 : i32
    %c0_i32_0 = arith.constant 0 : i32
    %c0_i32_1 = arith.constant 0 : i32
    return %arg0, %c0_i32, %c0_i32_0 : i32, i32, i32
  }
}

</mosaic_0001>

<bundles_post_ra>
// kernel: tpu_custom_call.1
= control target key start
LH: loop header
LB: loop body
LE: loop exit
PB: predicated region body
PF: predicated region fallthrough
CT: control target
= control target key end

     0   :  { %7 = vsyncpa [#allocation5], 0  ;;  %s300_s0 = inlined_call_operand.hbm [shape: f32[16,256], index: 0, kind: input, shape index: {}]   ;;  %s301_s1 = inlined_call_operand.hbm [shape: f32[16,256], index: 1, kind: input, shape index: {}]   ;;  %s302_s2 = inlined_call_operand.hbm [shape: f32[1,8,128], index: 2, kind: output, shape index: {}]  }
   0x1   :  { %8 = vsyncpa [#allocation8], 0 }
   0x2   :  { %9 = vsyncpa [#allocation6], 0  ;;  %s21_s11 = sshll.u32 %s300_s0, 4  ;;  %s271_s12 = smov [#allocation4]   ;;  %s22_s11 = int_to_ptr.hbm [resolvable:$true] %s21_s11 }
   0x3   :  { %s23_s13 = sshll.u32 %s271_s12, 4  ;;  %s41_s16 = sshll.u32 %s301_s1, 4  ;;  %s24_s13 = int_to_ptr.vmem [resolvable:$true] %s23_s13  ;;  %s42_s16 = int_to_ptr.hbm [resolvable:$true] %s41_s16 }
   0x4   :  { %s272_s17 = smov 256   ;;  %s273_s18 = smov 16  }
   0x5   :  { %29 = dma.hbm_to_vmem [thread:$0]  %s22_s11, 512, %s24_s13, [#allocation5], %s272_s17, %s272_s17, %s273_s18  }
   0x6   :  { %s274_s19 = smov [#allocation7]  }
   0x7   :  { %s43_s20 = sshll.u32 %s274_s19, 4  ;;  %s44_s20 = int_to_ptr.vmem [resolvable:$true] %s43_s20 }
   0x8   :  { %49 = dma.hbm_to_vmem [thread:$0]  %s42_s16, 512, %s44_s20, [#allocation8], %s272_s17, %s272_s17, %s273_s18  }
   0x9   :  { %265 = dma.done.wait [#allocation5], 512  }
   0xa   :  { %266 = vsyncadd [#allocation5], 4294966784 }
   0xb   :  { %267 = dma.done.wait [#allocation8], 512  }
   0xc   :  { %268 = vsyncadd [#allocation8], 4294966784  ;;  %v74_v0 = vld [vmem:[#allocation4] sm:$0xff]  ;;  %v75_v1 = vld [vmem:[#allocation4 + $0x8] sm:$0xff]  ;;  %v153_v48 = vlaneseq  ;;  %s275_s0 = smov [#allocation9]   ;;  %s169_s24 = sshll.u32 %s302_s2, 4  ;;  %s170_s24 = int_to_ptr.hbm [resolvable:$true] %s169_s24 }
   0xd   :  { %v76_v2 = vld [vmem:[#allocation4 + $0x10] sm:$0xff]  ;;  %v77_v3 = vld [vmem:[#allocation4 + $0x18] sm:$0xff]  ;;  %v78_v4 = vld [vmem:[#allocation7] sm:$0xff]  ;;  %v102_v6 = vmul.f32 %v74_v0, %v74_v0  ;;  %v103_v7 = vmul.f32 %v75_v1, %v75_v1  ;;  %s167_s1 = sshll.u32 %s275_s0, 4  ;;  %s168_s1 = int_to_ptr.vmem [resolvable:$true] %s167_s1 }
   0xe   :  { %v79_v5 = vld [vmem:[#allocation7 + $0x8] sm:$0xff]  ;;  %v80_v8 = vld [vmem:[#allocation7 + $0x10] sm:$0xff]  ;;  %v81_v9 = vld [vmem:[#allocation7 + $0x18] sm:$0xff]  ;;  %v82_v10 = vsub.f32 %v74_v0, %v78_v4  ;;  %vm86_vm0 = vcmp.eq.f32.partialorder %v78_v4, 1.0  ;;  %v104_v12 = vmul.f32 %v76_v2, %v76_v2  ;;  %vm90_vm4 = vcmp.eq.f32.partialorder %v78_v4, 0.0 }
   0xf   :  { %v83_v11 = vsub.f32 %v75_v1, %v79_v5  ;;  %v84_v13 = vsub.f32 %v76_v2, %v80_v8  ;;  %v85_v14 = vsub.f32 %v77_v3, %v81_v9  ;;  %vm87_vm1 = vcmp.eq.f32.partialorder %v79_v5, 1.0 }
  0x10   :  { %vm88_vm2 = vcmp.eq.f32.partialorder %v80_v8, 1.0  ;;  %vm89_vm3 = vcmp.eq.f32.partialorder %v81_v9, 1.0  ;;  %v94_v15 = vmul.f32 %v82_v10, %v82_v10  ;;  %vm91_vm5 = vcmp.eq.f32.partialorder %v79_v5, 0.0 }
  0x11   :  { %v95_v16 = vmul.f32 %v83_v11, %v83_v11  ;;  %v96_v17 = vmul.f32 %v84_v13, %v84_v13  ;;  %v97_v18 = vmul.f32 %v85_v14, %v85_v14  ;;  %vm92_vm6 = vcmp.eq.f32.partialorder %v80_v8, 0.0 }
  0x12   :  { %v98_v19 = vsel %vm86_vm0, %v94_v15, 0.0  ;;  %vm93_vm7 = vcmp.eq.f32.partialorder %v81_v9, 0.0  ;;  %v105_v21 = vmul.f32 %v77_v3, %v77_v3  ;;  %v106_v26 = vsel %vm90_vm4, %v102_v6, 0.0 }
  0x13   :  { %v99_v20 = vsel %vm87_vm1, %v95_v16, 0.0  ;;  %v100_v22 = vsel %vm88_vm2, %v96_v17, 0.0  ;;  %v101_v23 = vsel %vm89_vm3, %v97_v18, 0.0  ;;  %v107_v27 = vsel %vm91_vm5, %v103_v7, 0.0 }
  0x14   :  { %v112_v24 = vadd.f32 %v100_v22, %v98_v19  ;;  %v113_v25 = vadd.f32 %v101_v23, %v99_v20  ;;  %v108_v28 = vsel %vm92_vm6, %v104_v12, 0.0  ;;  %v109_v29 = vsel %vm93_vm7, %v105_v21, 0.0 }
  0x15   :  { %v120_v31 = vadd.f32 %v108_v28, %v106_v26  ;;  %v121_v32 = vadd.f32 %v109_v29, %v107_v27  ;;  %v154_v49 = vand.u32 127, %v153_v48 }
  0x16   :  { %v131_v30 = vadd.f32 %v113_v25, %v112_v24 }
  0x17   :  { %v143_v33 = vadd.f32 %v121_v32, %v120_v31  ;;  %vm156_vm8 = vcmp.eq.s32.totalorder %v154_v49, 1  ;;  %vm155_vm9 = vcmp.eq.s32.totalorder %v154_v49, 0 }
  0x18   :  { %132 = vadd.xlane.f32.xlu0 %v131_v30 }
  0x20   :  { %144 = vadd.xlane.f32.xlu0 %v143_v33 }
  0x8b   :  { %v133_v34 = vpop.xlane.xlu0 %132 }
  0x8c   :  { %v134_v35 = vrot.slane %v133_v34, 4 }
  0x8e   :  { %v135_v36 = vadd.f32 %v134_v35, %v133_v34 }
  0x90   :  { %v136_v37 = vrot.slane %v135_v36, 2 }
  0x92   :  { %v137_v38 = vadd.f32 %v136_v37, %v135_v36 }
  0x93   :  { %v145_v39 = vpop.xlane.xlu0 %144 }
  0x94   :  { %v146_v40 = vrot.slane %v145_v39, 4  ;;  %v138_v41 = vrot.slane %v137_v38, 1 }
  0x96   :  { %v147_v42 = vadd.f32 %v146_v40, %v145_v39  ;;  %v139_v43 = vadd.f32 %v138_v41, %v137_v38 }
  0x98   :  { %v148_v44 = vrot.slane %v147_v42, 2  ;;  %184 = vpush %v139_v43 }
  0x9a   :  { %v149_v45 = vadd.f32 %v148_v44, %v147_v42 }
  0x9c   :  { %v150_v46 = vrot.slane %v149_v45, 1 }
  0x9e   :  { %v151_v47 = vadd.f32 %v150_v46, %v149_v45 }
  0xa0   :  { %186 = vpush %v151_v47 }
  0xc9   :  { %s185_s21 = spop %184 }
  0xca   :  { %v159_v51 = vstv %s185_s21 }
  0xd1   :  { %s187_s25 = spop %186 }
  0xd2   :  { %v157_v50 = vstv %s187_s25 }
  0xd3   :  { %v158_v52 = vsel %vm156_vm8, %v157_v50, 0.0 }
  0xd4   :  { %v160_v53 = vsel %vm155_vm9, %v159_v51, %v158_v52 }
  0xd5   :  { %161 = vst [vmem:[#allocation9] sm:$0xff] %v160_v53 }
  0xd6   :  { %172 = dma.vmem_to_hbm [thread:$0]  %s168_s1, 128, %s170_s24, [#allocation6]  }
  0xd7   :  { %269 = dma.done.wait [#allocation6], 128  }
  0xd8   :  { %270 = vsyncadd [#allocation6], 4294967168 }
  0xd9   :  { %177 = vsyncpa [#allocation5], 1 }
  0xda   :  { %178 = vsyncpa [#allocation8], 1 }
  0xdb   :  { %179 = vsyncpa [#allocation6], 1 }

</bundles_post_ra>
